<compile_context>
chip_gen: v7x
topology: tpu7x:2x2x1
jax: 0.10.0
libtpu: 0.0.40
codegen_flags: <defaults>
</compile_context>

<pallas_src>
import functools

import jax
import jax.numpy as jnp
from jax.experimental import pallas as pl
from jax.experimental.pallas import tpu as pltpu


def _decoder_kernel(x_ref, w_ref, b_ref, o_ref, acc_ref):
    # x_ref : (TB, THW, C)   activation tile (native dtype), C on lanes
    # w_ref : (C, NP)        f32 weight, pre-transposed, pre-scaled by 1/(H*W)
    # b_ref : (1, NP)        f32 bias (zero-padded)
    # o_ref : (TB, NP)       output logits (resident across the reduction axis)
    # acc_ref: (TB, C) f32   running spatial sum
    j = pl.program_id(1)

    @pl.when(j == 0)
    def _init():
        acc_ref[...] = jnp.zeros_like(acc_ref)

    # Partial spatial sum for this tile (f32 accumulate, sublane reduction).
    acc_ref[...] += jnp.sum(x_ref[...].astype(jnp.float32), axis=1)

    @pl.when(j == pl.num_programs(1) - 1)
    def _finalize():
        logits = jnp.dot(acc_ref[...], w_ref[...],
                         preferred_element_type=jnp.float32)   # (TB, NP) on MXU
        o_ref[...] = (logits + b_ref[...]).astype(o_ref.dtype)


def _pick_divisor(total, cap):
    t = max(1, min(total, cap))
    while total % t:
        t -= 1
    return t


@functools.partial(jax.jit, static_argnames=("spatial_tile", "vmem_tile_bytes"))
def resnet_decoder(x_nchw, weight, bias, *, spatial_tile=128,
                   vmem_tile_bytes=6 * 1024 * 1024):
    """ResnetDecoder forward: AdaptiveAvgPool2d((1,1)) + Linear.

    x_nchw: (B, C, H, W); weight: (n_classes, C); bias: (n_classes,).
    Returns (B, n_classes) in x's dtype.
    """
    B, C, H, W = x_nchw.shape
    n_classes = weight.shape[0]
    hw = H * W
    out_dtype = x_nchw.dtype

    # Channel-last, lane-dense activation layout: (B, HW, C).
    x = jnp.transpose(x_nchw.reshape(B, C, hw), (0, 2, 1))

    # Spatial (reduction) tile: multiple of 8 sublanes, capped; zero-pad HW.
    thw = max(8, min(spatial_tile, ((hw + 7) // 8) * 8))
    hw_pad = ((hw + thw - 1) // thw) * thw
    if hw_pad != hw:
        x = jnp.pad(x, ((0, 0), (0, hw_pad - hw), (0, 0)))

    # Batch tile sized so one activation tile stays inside the VMEM budget
    # (double-buffered by the pipeline -> ~2x this per input).
    itemsize = jnp.dtype(x.dtype).itemsize
    tb_cap = max(1, vmem_tile_bytes // (thw * C * itemsize))
    tb = _pick_divisor(B, min(tb_cap, 128))

    # Lane-dense class dim: zero-pad to a multiple of 128.  Fold the 1/(H*W)
    # pooling scale into the (transposed) weight so the kernel only sums.
    np_pad = ((n_classes + 127) // 128) * 128
    w = jnp.zeros((C, np_pad), jnp.float32)
    w = w.at[:, :n_classes].set(jnp.asarray(weight, jnp.float32).T / float(hw))
    b = jnp.zeros((1, np_pad), jnp.float32)
    b = b.at[0, :n_classes].set(jnp.asarray(bias, jnp.float32))

    grid = (B // tb, hw_pad // thw)

    out = pl.pallas_call(
        _decoder_kernel,
        out_shape=jax.ShapeDtypeStruct((B, np_pad), jnp.float32),
        grid_spec=pltpu.PrefetchScalarGridSpec(
            num_scalar_prefetch=0,
            grid=grid,
            in_specs=[
                pl.BlockSpec((tb, thw, C), lambda i, j: (i, j, 0)),
                pl.BlockSpec((C, np_pad), lambda i, j: (0, 0)),
                pl.BlockSpec((1, np_pad), lambda i, j: (0, 0)),
            ],
            out_specs=pl.BlockSpec((tb, np_pad), lambda i, j: (i, 0)),
            scratch_shapes=[pltpu.VMEM((tb, C), jnp.float32)],
        ),
        compiler_params=pltpu.CompilerParams(
            dimension_semantics=("parallel", "arbitrary"),
            vmem_limit_bytes=32 * 1024 * 1024,
        ),
    )(x, w, b)

    return out[:, :n_classes].astype(out_dtype)


if __name__ == "__main__":
    # Small, module-consistent shapes: batch=2, in_features=4, spatial=16x16,
    # n_classes=8.
    B, C, H, W = 2, 4, 16, 16
    n_classes = 8

    key = jax.random.PRNGKey(0)
    kx, kw, kb = jax.random.split(key, 3)

    x = jax.random.normal(kx, (B, C, H, W), dtype=jnp.float32)

    # Deterministic Linear params (nn.Linear-style uniform(-1/sqrt(C), 1/sqrt(C))).
    bound = 1.0 / jnp.sqrt(jnp.float32(C))
    weight = jax.random.uniform(kw, (n_classes, C), jnp.float32, -bound, bound)
    bias = jax.random.uniform(kb, (n_classes,), jnp.float32, -bound, bound)

    out = resnet_decoder(x, weight, bias)
    out = jax.block_until_ready(out)

    # Pure-JAX reference.
    ref = jnp.mean(x, axis=(2, 3)) @ weight.T + bias
    assert out.shape == (B, n_classes)
    assert jnp.allclose(out, ref, atol=1e-4, rtol=1e-4), "mismatch vs reference"

    print("KERNEL_OK")
</pallas_src>

<mosaic_0001>
module attributes {stable_mosaic.version = 11 : i64} {
  func.func @_decoder_kernel(%arg0: i32, %arg1: i32, %arg2: memref<2x128x4xf32, #tpu.memory_space<vmem>>, %arg3: memref<4x128xf32, #tpu.memory_space<vmem>>, %arg4: memref<1x128xf32, #tpu.memory_space<vmem>>, %arg5: memref<2x128xf32, #tpu.memory_space<vmem>>, %arg6: memref<2x4xf32, #tpu.memory_space<vmem>>) attributes {dimension_semantics = [#tpu.dimension_semantics<parallel>, #tpu.dimension_semantics<arbitrary>], iteration_bounds = array<i64: 1, 2>, scalar_prefetch = 0 : i64, scratch_operands = 1 : i64, tpu.core_type = #tpu.core_type<tc>, window_params = [{transform_indices = @transform_0, window_bounds = array<i64: 2, 128, 4>}, {pipeline_mode = #tpu.pipeline_mode<synchronous>, transform_indices = @transform_1, window_bounds = array<i64: 4, 128>}, {pipeline_mode = #tpu.pipeline_mode<synchronous>, transform_indices = @transform_2, window_bounds = array<i64: 1, 128>}, {transform_indices = @transform_3, window_bounds = array<i64: 2, 128>}]} {
    %c0_i32 = arith.constant 0 : i32
    %0 = arith.cmpi eq, %arg1, %c0_i32 : i32
    %1 = arith.extui %0 : i1 to i32
    %c0_i32_0 = arith.constant 0 : i32
    %2 = arith.cmpi ne, %1, %c0_i32_0 : i32
    scf.if %2 {
      %cst_8 = arith.constant 0.000000e+00 : f32
      %11 = vector.broadcast %cst_8 : f32 to vector<2x4xf32>
      %c0_9 = arith.constant 0 : index
      %c0_10 = arith.constant 0 : index
      %12 = vector.load %arg6[%c0_9, %c0_10] : memref<2x4xf32, #tpu.memory_space<vmem>>, vector<2x4xf32>
      tpu.vector_store %arg6[%c0_9, %c0_10], %11 {strides = array<i32>} : memref<2x4xf32, #tpu.memory_space<vmem>>, vector<2x4xf32>,
    } else {
    }
    %c0 = arith.constant 0 : index
    %c0_1 = arith.constant 0 : index
    %3 = vector.load %arg6[%c0, %c0_1] : memref<2x4xf32, #tpu.memory_space<vmem>>, vector<2x4xf32>
    %c0_2 = arith.constant 0 : index
    %c0_3 = arith.constant 0 : index
    %c0_4 = arith.constant 0 : index
    %4 = vector.load %arg2[%c0_2, %c0_3, %c0_4] : memref<2x128x4xf32, #tpu.memory_space<vmem>>, vector<2x128x4xf32>
    %cst = arith.constant dense<0.000000e+00> : vector<2x4xf32>
    %5 = vector.multi_reduction <add>, %4, %cst [1] : vector<2x128x4xf32> to vector<2x4xf32>
    %6 = arith.addf %3, %5 : vector<2x4xf32>
    %c0_5 = arith.constant 0 : index
    %c0_6 = arith.constant 0 : index
    %7 = vector.load %arg6[%c0_5, %c0_6] : memref<2x4xf32, #tpu.memory_space<vmem>>, vector<2x4xf32>
    tpu.vector_store %arg6[%c0_5, %c0_6], %6 {strides = array<i32>} : memref<2x4xf32, #tpu.memory_space<vmem>>, vector<2x4xf32>,
    %c1_i32 = arith.constant 1 : i32
    %8 = arith.cmpi eq, %arg1, %c1_i32 : i32
    %9 = arith.extui %8 : i1 to i32
    %c0_i32_7 = arith.constant 0 : i32
    %10 = arith.cmpi ne, %9, %c0_i32_7 : i32
    scf.if %10 {
      %c0_8 = arith.constant 0 : index
      %c0_9 = arith.constant 0 : index
      %11 = vector.load %arg6[%c0_8, %c0_9] : memref<2x4xf32, #tpu.memory_space<vmem>>, vector<2x4xf32>
      %c0_10 = arith.constant 0 : index
      %c0_11 = arith.constant 0 : index
      %12 = vector.load %arg3[%c0_10, %c0_11] : memref<4x128xf32, #tpu.memory_space<vmem>>, vector<4x128xf32>
      %cst_12 = arith.constant dense<0.000000e+00> : vector<2x128xf32>
      %13 = tpu.matmul %11, %12, %cst_12 {dimension_numbers = #tpu.dot_dimension_numbers<[1], [0], [0], [1], [0, 0, 1, 1], [], []>} : vector<2x4xf32>, vector<4x128xf32>, vector<2x128xf32> -> vector<2x128xf32>
      %c0_13 = arith.constant 0 : index
      %c0_14 = arith.constant 0 : index
      %14 = vector.load %arg4[%c0_13, %c0_14] : memref<1x128xf32, #tpu.memory_space<vmem>>, vector<1x128xf32>
      %15 = vector.broadcast %14 : vector<1x128xf32> to vector<2x128xf32>
      %16 = arith.addf %13, %15 : vector<2x128xf32>
      %c0_15 = arith.constant 0 : index
      %c0_16 = arith.constant 0 : index
      %17 = vector.load %arg5[%c0_15, %c0_16] : memref<2x128xf32, #tpu.memory_space<vmem>>, vector<2x128xf32>
      tpu.vector_store %arg5[%c0_15, %c0_16], %16 {strides = array<i32>} : memref<2x128xf32, #tpu.memory_space<vmem>>, vector<2x128xf32>,
    } else {
    }
    return
  }
  func.func @transform_0(%arg0: i32, %arg1: i32) -> (i32, i32, i32) {
    %c0_i32 = arith.constant 0 : i32
    %c0_i32_0 = arith.constant 0 : i32
    return %arg0, %arg1, %c0_i32 : i32, i32, i32
  }
  func.func @transform_1(%arg0: i32, %arg1: i32) -> (i32, i32) {
    %c0_i32 = arith.constant 0 : i32
    %c0_i32_0 = arith.constant 0 : i32
    %c0_i32_1 = arith.constant 0 : i32
    return %c0_i32, %c0_i32_0 : i32, i32
  }
  func.func @transform_2(%arg0: i32, %arg1: i32) -> (i32, i32) {
    %c0_i32 = arith.constant 0 : i32
    %c0_i32_0 = arith.constant 0 : i32
    %c0_i32_1 = arith.constant 0 : i32
    return %c0_i32, %c0_i32_0 : i32, i32
  }
  func.func @transform_3(%arg0: i32, %arg1: i32) -> (i32, i32) {
    %c0_i32 = arith.constant 0 : i32
    %c0_i32_0 = arith.constant 0 : i32
    return %arg0, %c0_i32 : i32, i32
  }
}

</mosaic_0001>

<bundles_post_ra>
// kernel: resnet_decoder.1
= control target key start
LH: loop header
LB: loop body
LE: loop exit
PB: predicated region body
PF: predicated region fallthrough
CT: control target
= control target key end

     0   :  { %8 = vsyncpa [#allocation5], 0  ;;  %s790_s12 = smov 0   ;;  %s792_s13 = smov 0   ;;  %s1023_s0 = inlined_call_operand.vmem [shape: f32[2,256,4], index: 0, kind: input, shape index: {}]   ;;  %s1024_s1 = inlined_call_operand.vmem [shape: f32[4,128], index: 1, kind: input, shape index: {}]   ;;  %s1025_s2 = inlined_call_operand.vmem [shape: f32[1,128], index: 2, kind: input, shape index: {}]   ;;  %s1026_s3 = inlined_call_operand.hbm [shape: f32[2,128], index: 3, kind: output, shape index: {}]  }
   0x1   :  { %s794_s14 = smov 0   ;;  %s796_s15 = smov 0  }
   0x2   :  { %s798_s16 = smov 0  }
   0x3 LB: > { %s621_s17 = sadd.s32 4294967295, %s764_s16   ;;  %s23_s18 = sadd.s32 1, %s760_s15  ;;  %s764_s16 = sphi %s798_s16, %s14_s16   ;;  %s760_s15 = sphi %s796_s15, %s1031_s15   ;;  %s756_s14 = sphi %s794_s14, %s1030_s14   ;;  %s752_s13 = sphi %s792_s13, %s1029_s13   ;;  %s748_s12 = sphi %s790_s12, %s1028_s12  }
   0x4   : > { %p24_p0 = scmp.ge.s32.totalorder %s23_s18, 2  ;;  %p42_p1 = scmp.ne.s32.totalorder %s752_s13, %s748_s12 }
   0x5   : > { %p43_p2 = scmp.eq.s32.totalorder %s764_s16, 0  ;;  %s35_s20 = sadd.s32 1, %s752_s13 }
   0x6   : > { %s1033_s18 = smov (%p24_p0, %s23_s18), 0  ;;  %p623_p5 = scmp.ge.s32.totalorder %s764_s16, 2 }
   0x7   : > { %p44_p3 = por %p43_p2, %p42_p1  ;;  %s31_s19 = ssub.s32 %s760_s15, %s1033_s18 }
   0x8   : > { %p33_p4 = scmp.eq.s32.totalorder %s31_s19, 0  ;;  %142 = sbr.rel (%p623_p5) target bundleno = 35 (0x23), region = 24 }
   0xa   : > { %s826_s21 = scalar_select %p33_p4, %s752_s13, %s35_s20  }
   0xf   : > { %145 = sbr.rel (!%p44_p3) target bundleno = 35 (0x23), region = 28  ;;  %s147_s22 = sand.u32 (%p44_p3), 1, %s752_s13  }
  0x10   : > { %s638_s23 = sshll.u32 (%p44_p3), %s760_s15, 7  ;;  %s624_s24 = sshll.u32 (%p44_p3), %s147_s22, 8 }
  0x11   : > { %s834_s27 = scalar_lea.vmem (%p44_p3), %s1023_s0, %s638_s23  ;;  %s839_s28 = scalar_lea.vmem (%p44_p3), [#allocation3], %s624_s24 }
  0x12   : > { %v245_v0 = vld [vmem:[%s834_s27] sm:$0xff] (%p44_p3)  ;;  %v247_v1 = vld [vmem:[%s834_s27 + $0x8] sm:$0xff] (%p44_p3)  ;;  %v249_v2 = vld [vmem:[%s834_s27 + $0x10] sm:$0xff] (%p44_p3) }
  0x13   : > { %246 = vst [vmem:[%s839_s28] sm:$0xff] (%p44_p3), %v245_v0  ;;  %248 = vst [vmem:[%s839_s28 + $0x8] sm:$0xff] (%p44_p3), %v247_v1  ;;  %v251_v3 = vld [vmem:[%s834_s27 + $0x18] sm:$0xff] (%p44_p3)  ;;  %v253_v4 = vld [vmem:[%s834_s27 + $0x20] sm:$0xff] (%p44_p3) }
  0x14   : > { %250 = vst [vmem:[%s839_s28 + $0x10] sm:$0xff] (%p44_p3), %v249_v2  ;;  %v255_v5 = vld [vmem:[%s834_s27 + $0x28] sm:$0xff] (%p44_p3)  ;;  %252 = vst [vmem:[%s839_s28 + $0x18] sm:$0xff] (%p44_p3), %v251_v3  ;;  %v257_v6 = vld [vmem:[%s834_s27 + $0x30] sm:$0xff] (%p44_p3) }
  0x15   : > { %254 = vst [vmem:[%s839_s28 + $0x20] sm:$0xff] (%p44_p3), %v253_v4  ;;  %256 = vst [vmem:[%s839_s28 + $0x28] sm:$0xff] (%p44_p3), %v255_v5  ;;  %v259_v7 = vld [vmem:[%s834_s27 + $0x38] sm:$0xff] (%p44_p3)  ;;  %v261_v8 = vld [vmem:[%s834_s27 + $0x40] sm:$0xff] (%p44_p3) }
  0x16   : > { %258 = vst [vmem:[%s839_s28 + $0x30] sm:$0xff] %v257_v6  ;;  %260 = vst [vmem:[%s839_s28 + $0x38] sm:$0xff] %v259_v7  ;;  %v263_v9 = vld [vmem:[%s834_s27 + $0x48] sm:$0xff]  ;;  %v265_v10 = vld [vmem:[%s834_s27 + $0x50] sm:$0xff] }
  0x17   : > { %262 = vst [vmem:[%s839_s28 + $0x40] sm:$0xff] %v261_v8  ;;  %v267_v11 = vld [vmem:[%s834_s27 + $0x58] sm:$0xff]  ;;  %264 = vst [vmem:[%s839_s28 + $0x48] sm:$0xff] %v263_v9  ;;  %v269_v12 = vld [vmem:[%s834_s27 + $0x60] sm:$0xff] }
  0x18   : > { %266 = vst [vmem:[%s839_s28 + $0x50] sm:$0xff] %v265_v10  ;;  %268 = vst [vmem:[%s839_s28 + $0x58] sm:$0xff] %v267_v11  ;;  %v271_v13 = vld [vmem:[%s834_s27 + $0x68] sm:$0xff]  ;;  %v273_v14 = vld [vmem:[%s834_s27 + $0x70] sm:$0xff] }
  0x19   : > { %270 = vst [vmem:[%s839_s28 + $0x60] sm:$0xff] %v269_v12  ;;  %272 = vst [vmem:[%s839_s28 + $0x68] sm:$0xff] %v271_v13  ;;  %v275_v15 = vld [vmem:[%s834_s27 + $0x78] sm:$0xff]  ;;  %v277_v16 = vld [vmem:[%s834_s27 + $0x100] sm:$0xff] }
  0x1a   : > { %274 = vst [vmem:[%s839_s28 + $0x70] sm:$0xff] %v273_v14  ;;  %v279_v17 = vld [vmem:[%s834_s27 + $0x108] sm:$0xff]  ;;  %276 = vst [vmem:[%s839_s28 + $0x78] sm:$0xff] %v275_v15  ;;  %v281_v18 = vld [vmem:[%s834_s27 + $0x110] sm:$0xff] }
  0x1b   : > { %278 = vst [vmem:[%s839_s28 + $0x80] sm:$0xff] %v277_v16  ;;  %280 = vst [vmem:[%s839_s28 + $0x88] sm:$0xff] %v279_v17  ;;  %v283_v19 = vld [vmem:[%s834_s27 + $0x118] sm:$0xff]  ;;  %v285_v20 = vld [vmem:[%s834_s27 + $0x120] sm:$0xff] }
  0x1c   : > { %282 = vst [vmem:[%s839_s28 + $0x90] sm:$0xff] %v281_v18  ;;  %284 = vst [vmem:[%s839_s28 + $0x98] sm:$0xff] %v283_v19  ;;  %v287_v21 = vld [vmem:[%s834_s27 + $0x128] sm:$0xff]  ;;  %v289_v22 = vld [vmem:[%s834_s27 + $0x130] sm:$0xff] }
  0x1d   : > { %286 = vst [vmem:[%s839_s28 + $0xa0] sm:$0xff] %v285_v20  ;;  %v291_v23 = vld [vmem:[%s834_s27 + $0x138] sm:$0xff]  ;;  %288 = vst [vmem:[%s839_s28 + $0xa8] sm:$0xff] %v287_v21  ;;  %v293_v24 = vld [vmem:[%s834_s27 + $0x140] sm:$0xff] }
  0x1e   : > { %290 = vst [vmem:[%s839_s28 + $0xb0] sm:$0xff] %v289_v22  ;;  %292 = vst [vmem:[%s839_s28 + $0xb8] sm:$0xff] %v291_v23  ;;  %v295_v25 = vld [vmem:[%s834_s27 + $0x148] sm:$0xff]  ;;  %v297_v26 = vld [vmem:[%s834_s27 + $0x150] sm:$0xff] }
  0x1f   : > { %294 = vst [vmem:[%s839_s28 + $0xc0] sm:$0xff] %v293_v24  ;;  %296 = vst [vmem:[%s839_s28 + $0xc8] sm:$0xff] %v295_v25  ;;  %v299_v27 = vld [vmem:[%s834_s27 + $0x158] sm:$0xff]  ;;  %v301_v28 = vld [vmem:[%s834_s27 + $0x160] sm:$0xff] }
  0x20   : > { %298 = vst [vmem:[%s839_s28 + $0xd0] sm:$0xff] %v297_v26  ;;  %v303_v29 = vld [vmem:[%s834_s27 + $0x168] sm:$0xff]  ;;  %300 = vst [vmem:[%s839_s28 + $0xd8] sm:$0xff] %v299_v27  ;;  %v305_v30 = vld [vmem:[%s834_s27 + $0x170] sm:$0xff] }
  0x21   : > { %302 = vst [vmem:[%s839_s28 + $0xe0] sm:$0xff] %v301_v28  ;;  %304 = vst [vmem:[%s839_s28 + $0xe8] sm:$0xff] %v303_v29  ;;  %v307_v31 = vld [vmem:[%s834_s27 + $0x178] sm:$0xff] }
  0x22   : > { %306 = vst [vmem:[%s839_s28 + $0xf0] sm:$0xff] %v305_v30  ;;  %308 = vst [vmem:[%s839_s28 + $0xf8] sm:$0xff] %v307_v31 }
  0x23 PF: > { %p627_p6 = scmp.ge.s32.totalorder %s764_s16, 1  ;;  %p313_p7 = scmp.lt.s32.totalorder %s764_s16, 3 }
  0x25   : > { %p314_p8 = pnand %p627_p6, %p313_p7 }
  0x26   : > { %s320_s29 = sand.u32 (!%p314_p8), 1, %s748_s12   ;;  %p629_p9 = scmp.ne.s32.totalorder (!%p314_p8), %s756_s14, 0 }
  0x27   : > { %317 = sbr.rel (%p314_p8) target bundleno = 350 (0x15e), region = 66  ;;  %s628_s30 = sshll.u32 (!%p314_p8), %s320_s29, 8 }
  0x28   : > { %s905_s4 = scalar_lea.vmem (!%p314_p8), [#allocation3], %s628_s30 }
  0x2e   : > { %343 = sbr.rel (%p629_p9) target bundleno = 53 (0x35), region = 74  ;;  %vm344_vm0 = vcmask (!%p629_p9), 25600   ;;  %v766_v32 = vmov (!%p629_p9), 0.0  }
  0x2f   : > { %345 = vst.msk [vmem:[#allocation2] sm:$0x3] (!%p629_p9), %vm344_vm0, %v766_v32 }
  0x35 PF: > { %v347_v33 = vld [vmem:[%s905_s4] sm:$0xff]  ;;  %v348_v34 = vld [vmem:[%s905_s4 + $0x8] sm:$0xff]  ;;  %vm379_vm1 = vcmask 31744   ;;  %v349_v35 = vld [vmem:[%s905_s4 + $0x10] sm:$0xff]  ;;  %vm456_vm2 = vcmask 1041409   ;;  %vm460_vm3 = vcmask 25600  }
  0x36   : > { %v350_v36 = vld [vmem:[%s905_s4 + $0x18] sm:$0xff]  ;;  %v380_v37 = vsel %vm379_vm1, %v347_v33, 0.0  ;;  %v381_v38 = vsel %vm379_vm1, %v348_v34, 0.0  ;;  %v351_v39 = vld [vmem:[%s905_s4 + $0x20] sm:$0xff]  ;;  %v383_v41 = vsel %vm379_vm1, %v349_v35, 0.0  ;;  %v352_v43 = vld [vmem:[%s905_s4 + $0x28] sm:$0xff] }
  0x37   : > { %v382_v40 = vadd.f32 %v381_v38, %v380_v37  ;;  %v385_v42 = vsel %vm379_vm1, %v350_v36, 0.0  ;;  %v353_v45 = vld [vmem:[%s905_s4 + $0x30] sm:$0xff]  ;;  %v363_v46 = vld [vmem:[%s905_s4 + $0x80] sm:$0xff]  ;;  %v387_v47 = vsel %vm379_vm1, %v351_v39, 0.0  ;;  %v364_v48 = vld [vmem:[%s905_s4 + $0x88] sm:$0xff]  ;;  %v389_v53 = vsel %vm379_vm1, %v352_v43, 0.0 }
  0x38   : > { %v365_v49 = vld [vmem:[%s905_s4 + $0x90] sm:$0xff]  ;;  %v366_v50 = vld [vmem:[%s905_s4 + $0x98] sm:$0xff]  ;;  %v417_v52 = vsel %vm379_vm1, %v363_v46, 0.0  ;;  %v418_v54 = vsel %vm379_vm1, %v364_v48, 0.0  ;;  %v367_v57 = vld [vmem:[%s905_s4 + $0xa0] sm:$0xff]  ;;  %v391_v60 = vsel %vm379_vm1, %v353_v45, 0.0 }
  0x39   : > { %v384_v44 = vadd.f32 %v383_v41, %v382_v40  ;;  %v420_v55 = vsel %vm379_vm1, %v365_v49, 0.0  ;;  %v354_v56 = vld [vmem:[%s905_s4 + $0x38] sm:$0xff]  ;;  %v419_v59 = vadd.f32 %v418_v54, %v417_v52  ;;  %v422_v61 = vsel %vm379_vm1, %v366_v50, 0.0  ;;  %v355_v62 = vld [vmem:[%s905_s4 + $0x40] sm:$0xff]  ;;  %v368_v63 = vld [vmem:[%s905_s4 + $0xa8] sm:$0xff]  ;;  %p630_p10 = scmp.ne.s32.totalorder %s756_s14, 1 }
  0x3a   : > { %v393_v2 = vsel %vm379_vm1, %v354_v56, 0.0  ;;  %v424_v3 = vsel %vm379_vm1, %v367_v57, 0.0  ;;  %v356_v4 = vld [vmem:[%s905_s4 + $0x48] sm:$0xff]  ;;  %v369_v5 = vld [vmem:[%s905_s4 + $0xb0] sm:$0xff]  ;;  %v395_v8 = vsel %vm379_vm1, %v355_v62, 0.0  ;;  %v426_v9 = vsel %vm379_vm1, %v368_v63, 0.0 }
  0x3b   : > { %v386_v51 = vadd.f32 %v385_v42, %v384_v44  ;;  %v421_v1 = vadd.f32 %v420_v55, %v419_v59  ;;  %v357_v10 = vld [vmem:[%s905_s4 + $0x50] sm:$0xff]  ;;  %v370_v11 = vld [vmem:[%s905_s4 + $0xb8] sm:$0xff]  ;;  %v397_v14 = vsel %vm379_vm1, %v356_v4, 0.0  ;;  %v428_v15 = vsel %vm379_vm1, %v369_v5, 0.0  ;;  %v371_v17 = vld [vmem:[%s905_s4 + $0xc0] sm:$0xff] }
  0x3c   : > { %v358_v16 = vld [vmem:[%s905_s4 + $0x58] sm:$0xff]  ;;  %v399_v20 = vsel %vm379_vm1, %v357_v10, 0.0  ;;  %v430_v21 = vsel %vm379_vm1, %v370_v11, 0.0  ;;  %v359_v22 = vld [vmem:[%s905_s4 + $0x60] sm:$0xff]  ;;  %v372_v23 = vld [vmem:[%s905_s4 + $0xc8] sm:$0xff]  ;;  %v432_v27 = vsel %vm379_vm1, %v371_v17, 0.0 }
  0x3d   : > { %v388_v58 = vadd.f32 %v387_v47, %v386_v51  ;;  %v423_v7 = vadd.f32 %v422_v61, %v421_v1  ;;  %v401_v26 = vsel %vm379_vm1, %v358_v16, 0.0  ;;  %v360_v28 = vld [vmem:[%s905_s4 + $0x68] sm:$0xff]  ;;  %v373_v29 = vld [vmem:[%s905_s4 + $0xd0] sm:$0xff]  ;;  %v403_v32 = vsel %vm379_vm1, %v359_v22, 0.0  ;;  %v374_v35 = vld [vmem:[%s905_s4 + $0xd8] sm:$0xff] }
  0x3e   : > { %v434_v33 = vsel %vm379_vm1, %v372_v23, 0.0  ;;  %v361_v34 = vld [vmem:[%s905_s4 + $0x70] sm:$0xff]  ;;  %v405_v38 = vsel %vm379_vm1, %v360_v28, 0.0  ;;  %v436_v39 = vsel %vm379_vm1, %v373_v29, 0.0  ;;  %v362_v40 = vld [vmem:[%s905_s4 + $0x78] sm:$0xff]  ;;  %v375_v41 = vld [vmem:[%s905_s4 + $0xe0] sm:$0xff] }
  0x3f   : > { %v390_v0 = vadd.f32 %v389_v53, %v388_v58  ;;  %v425_v13 = vadd.f32 %v424_v3, %v423_v7  ;;  %v407_v44 = vsel %vm379_vm1, %v361_v34, 0.0  ;;  %v438_v45 = vsel %vm379_vm1, %v374_v35, 0.0  ;;  %v376_v46 = vld [vmem:[%s905_s4 + $0xe8] sm:$0xff]  ;;  %v377_v51 = vld [vmem:[%s905_s4 + $0xf0] sm:$0xff]  ;;  %v378_v55 = vld [vmem:[%s905_s4 + $0xf8] sm:$0xff] }
  0x40   : > { %v409_v49 = vsel %vm379_vm1, %v362_v40, 0.0  ;;  %v440_v50 = vsel %vm379_vm1, %v375_v41, 0.0  ;;  %v442_v54 = vsel %vm379_vm1, %v376_v46, 0.0  ;;  %v444_v58 = vsel %vm379_vm1, %v377_v51, 0.0  ;;  %v346_v10 = vld [vmem:[#allocation2] sm:$0x3] }
  0x41   : > { %v392_v6 = vadd.f32 %v391_v60, %v390_v0  ;;  %v427_v19 = vadd.f32 %v426_v9, %v425_v13  ;;  %v446_v61 = vsel %vm379_vm1, %v378_v55, 0.0  ;;  %vm478_vm4 = vcmask (!%p630_p10), 1043456   ;;  %v631_v17 = vld [vmem:[%s1025_s2] ss:$0 sm:$0xff] (!%p630_p10) }
  0x42   : > { %vm768_vm5 = vmmov (!%p630_p10), 0  }
  0x43   : > { %v394_v12 = vadd.f32 %v393_v2, %v392_v6  ;;  %v429_v25 = vadd.f32 %v428_v15, %v427_v19  ;;  %v767_v15 = vmov (!%p630_p10), 0.0  }
  0x44   : > { %641 = vmatprep.subr.mxu0 (!%p630_p10), %v767_v15  ;;  %643 = vmatprep.mubr.msk.f32.mxu0 (!%p630_p10), %vm768_vm5, %v767_v15 }
  0x45   : > { %v396_v18 = vadd.f32 %v395_v8, %v394_v12  ;;  %v431_v31 = vadd.f32 %v430_v21, %v429_v25 }
  0x47   : > { %v398_v24 = vadd.f32 %v397_v14, %v396_v18  ;;  %v433_v37 = vadd.f32 %v432_v27, %v431_v31  ;;  %v467_v14 = vld [vmem:[%s1024_s1] sm:$0xf] (!%p630_p10) }
  0x48   : > { %642 = vmatpush3.msk.msra.mxu0 (!%p630_p10), %vm478_vm4, %v467_v14 }
  0x49   : > { %v400_v30 = vadd.f32 %v399_v20, %v398_v24  ;;  %v435_v43 = vadd.f32 %v434_v33, %v433_v37 }
  0x4b   : > { %v402_v36 = vadd.f32 %v401_v26, %v400_v30  ;;  %v437_v48 = vadd.f32 %v436_v39, %v435_v43 }
  0x4d   : > { %v404_v42 = vadd.f32 %v403_v32, %v402_v36  ;;  %v439_v53 = vadd.f32 %v438_v45, %v437_v48 }
  0x4f   : > { %v406_v47 = vadd.f32 %v405_v38, %v404_v42  ;;  %v441_v57 = vadd.f32 %v440_v50, %v439_v53 }
  0x51   : > { %v408_v52 = vadd.f32 %v407_v44, %v406_v47  ;;  %v443_v60 = vadd.f32 %v442_v54, %v441_v57 }
  0x53   : > { %v410_v56 = vadd.f32 %v409_v49, %v408_v52  ;;  %v445_v63 = vadd.f32 %v444_v58, %v443_v60 }
  0x55   : > { %v411_v59 = vrot.slane %v410_v56, 4  ;;  %v447_v1 = vadd.f32 %v446_v61, %v445_v63 }
  0x57   : > { %v412_v62 = vadd.f32 %v411_v59, %v410_v56  ;;  %v448_v3 = vrot.slane %v447_v1, 4 }
  0x59   : > { %v413_v0 = vrot.slane %v412_v62, 2  ;;  %v449_v4 = vadd.f32 %v448_v3, %v447_v1 }
  0x5b   : > { %v414_v2 = vadd.f32 %v413_v0, %v412_v62  ;;  %v450_v6 = vrot.slane %v449_v4, 2 }
  0x5d   : > { %v415_v5 = vrot.slane %v414_v2, 1  ;;  %v451_v7 = vadd.f32 %v450_v6, %v449_v4 }
  0x5f   : > { %v416_v8 = vadd.f32 %v415_v5, %v414_v2  ;;  %v452_v9 = vrot.slane %v451_v7, 1 }
  0x60   : > { %465 = sbr.rel (%p630_p10) target bundleno = 325 (0x145), region = 78 }
  0x61   : > { %v453_v11 = vadd.f32 %v452_v9, %v451_v7 }
  0x63   : > { %v457_v12 = vsel %vm456_vm2, %v453_v11, %v416_v8 }
  0x64   : > { %v459_v13 = vadd.f32 %v457_v12, %v346_v10 }
  0x66   : > { %461 = vst.msk [vmem:[#allocation2] sm:$0x3] %vm460_vm3, %v459_v13 }
  0x6d   : > { %v466_v16 = vld [vmem:[#allocation2] sm:$0x3] }
  0x6e   : > { %644 = vmatmul.mubr.msk.f32.vlgmr.msra.gmra.mrb[0].mxu0 %vm379_vm1, %v466_v16 }
 0x141   : > { %v548_v18 = vpop.f32.mrb[0].mxu0 }
 0x142   : > { %v549_v19 = vadd.f32 %v631_v17, %v548_v18  ;;  %v645_v20 = vpop.f32.mrb[1].mxu0 }
 0x144   : > { %552 = vst [vmem:[#allocation4] sm:$0x3] %v549_v19 }
 0x145 PF: > { %p982_p11 = scmp.eq.s32.totalorder %s621_s17, 1  ;;  %s769_s10 = smov [#allocation4]  }
 0x146   : > { %s562_s11 = sshll.u32 %s769_s10, 4  ;;  %s563_s11 = int_to_ptr.vmem [resolvable:$true] %s562_s11 }
 0x147   : > { %s696_s12 = scalar_lea.vmem %s563_s11, 32  ;;  %p703_p1 = scmp.lt.s32.totalorder %s563_s11, %s563_s11 }
 0x148   : > { %p697_p12 = scmp.ne.s32.totalorder %s563_s11, %s696_s12  ;;  %p704_p2 = scmp.lt.s32.totalorder %s696_s12, %s696_s12 }
 0x14a   : > { %p698_p13 = pnand %p697_p12, %p982_p11  ;;  %p705_p3 = por %p704_p2, %p703_p1 }
 0x14c   : > { %p699_p0 = pneg %p698_p13 }
 0x14e   : > { %p706_p4 = pnand %p705_p3, %p699_p0 }
 0x150   : > { %709 = shalt.err (!%p706_p4)
}
 0x151   : > { %s710_s17 = scalar_lea.hbm %s1026_s3, 32 }
 0x152   : > { %p711_p5 = scmp.ne.s32.totalorder %s1026_s3, %s710_s17  ;;  %p716_p8 = scmp.lt.u32.totalorder %s710_s17, %s1026_s3 }
 0x154   : > { %p712_p6 = pnand %p711_p5, %p982_p11 }
 0x156   : > { %p713_p7 = pneg %p712_p6 }
 0x158   : > { %p718_p9 = pnand %p716_p8, %p713_p7 }
 0x15a   : > { %721 = shalt.err (!%p718_p9)
}
 0x15b   : > { %647 = dma.vmem_to_hbm [thread:$0]  (%p982_p11), %s563_s11, 32, %s1026_s3, [#allocation5]  }
 0x15c   : > { %743 = dma.done.wait (%p982_p11), [#allocation5], 32  }
 0x15d   : > { %745 = vsyncadd (%p982_p11), [#allocation5], 4294967264 }
 0x15e PF: > { %s14_s16 = sadd.s32 1, %s764_s16   ;;  %s1028_s12 = smov %s752_s13 }
 0x15f   : > { %p11_p10 = scmp.ge.s32.totalorder %s14_s16, 4   ;;  %s1029_s13 = smov %s826_s21 }
 0x160   : > { %s1030_s14 = smov %s760_s15  ;;  %s1031_s15 = smov %s1033_s18 }
 0x161   :  { %13 = sbr.rel (!%p11_p10) target bundleno = 3 (0x3), region = 111 }
 0x168   :  { %575 = vsyncpa [#allocation5], 1 }
 0x169   :  { %577 = vsyncpa [#allocation5 + $0x1], 1 }

</bundles_post_ra>
